<compile_context>
chip_gen: v6e
topology: v6e:2x2x1
jax: 0.10.0
libtpu: 0.0.40
codegen_flags: <defaults>
</compile_context>

<pallas_src>
import functools

import jax
import jax.numpy as jnp
import numpy as np
from jax.experimental import pallas as pl
from jax.experimental.pallas import tpu as pltpu

LANES = 128
_DEFAULT_BLOCK_ROWS = 8192          # 8192 x 128 x 4B = 4 MiB per f32 block


def _q_hswish_kernel(params_ref, x_ref, o_ref, *, n_lv, act_func, d):
    """Elementwise Q_HSwish on one (block_rows, 128) tile.

    params_ref (SMEM, f32[3]) = [k2, k3, scale] with
      k2    = (n_lv-1) / (6 * softplus(a))   (no /6 when act_func=False)
      k3    = b * (n_lv-1) / softplus(a)
      scale = softplus(c) / (n_lv-1)
    """
    x = x_ref[...].astype(jnp.float32)
    if n_lv == 0:
        # Hard-swish only (the pure-identity case never reaches the kernel).
        o = x * (jnp.clip(x + 3.0, 0.0, 6.0) * (1.0 / 6.0))
    else:
        k2 = params_ref[0]
        k3 = params_ref[1]
        scale = params_ref[2]
        if act_func:
            t = jnp.clip(x + 3.0, 0.0, 6.0)          # hardtanh(x+3, 0, 6)
            pre = x * t * k2 + k3                    # == ((hswish+b)/a)*(n_lv-1)
        else:
            pre = x * k2 + k3                        # == ((x+b)/a)*(n_lv-1)
        y = jnp.clip(pre, 0.0, float(n_lv - 1))      # hardtanh(.,0,1)*(n_lv-1)
        o = jnp.round(y) * scale + d                 # RoundQuant * c + d
    o_ref[...] = o.astype(o_ref.dtype)


def q_hswish(x, a_param, c_param, *, n_lv=0, act_func=True,
             b=3.0 / 8.0, d=-3.0 / 8.0, block_rows=_DEFAULT_BLOCK_ROWS,
             donate_x=False, dimension_semantics=None):
    """x: float array (treated elementwise, any shape).
    a_param / c_param: shape-(1,) float32 parameters (pre-softplus)."""
    orig_shape = x.shape
    orig_dtype = x.dtype
    n_lv = int(n_lv)

    # Identity: no activation and no quantization -> skip the kernel entirely.
    if n_lv == 0 and not act_func:
        return x

    flat = x.reshape(-1)
    n = flat.shape[0]

    # Lane alignment: pad only when numel is not a multiple of 128 (rare).
    rem = n % LANES
    if rem:
        flat = jnp.pad(flat, (0, LANES - rem))
    m = flat.shape[0] // LANES
    x2d = flat.reshape(m, LANES)

    # Sublane multiple depends on dtype packing (f32: 8, bf16: 16, int8: 32).
    itemsize = jnp.dtype(orig_dtype).itemsize
    row_mult = max(8, 32 // itemsize)
    br = max(1, min(int(block_rows), m))
    br = ((br + row_mult - 1) // row_mult) * row_mult
    grid = (pl.cdiv(m, br),)

    # Explicit scoped-VMEM budget: 2x double-buffered (in + out) blocks plus
    # headroom for f32 elementwise temporaries; capped for v7x (64 MiB phys).
    blk_in_bytes = br * LANES * itemsize
    blk_f32_bytes = br * LANES * 4
    vmem_limit = 4 * blk_in_bytes + 6 * blk_f32_bytes + (2 << 20)
    vmem_limit = max(16 << 20, min(vmem_limit, 48 << 20))

    # Fold scalar parameters once in the wrapper (f32; matches the reference
    # to f32 precision modulo reassociation of the divisions).
    if n_lv != 0:
        a = jax.nn.softplus(a_param.astype(jnp.float32).reshape(-1))[0]
        c = jax.nn.softplus(c_param.astype(jnp.float32).reshape(-1))[0]
        nm1 = float(n_lv - 1)
        inv_a = 1.0 / a
        k2 = inv_a * (nm1 / 6.0 if act_func else nm1)
        k3 = inv_a * (float(b) * nm1)
        scale = c / nm1
        params = jnp.stack([k2, k3, scale]).astype(jnp.float32)
    else:
        params = jnp.zeros((3,), jnp.float32)

    if dimension_semantics is None:
        # On v7x pass (pltpu.CORE_PARALLEL,) to shard row blocks across both
        # TensorCores; "parallel" is the portable default (single-TC chips).
        dimension_semantics = ("parallel",)

    kernel = functools.partial(
        _q_hswish_kernel, n_lv=n_lv, act_func=bool(act_func), d=float(d))

    call_kwargs = {}
    if donate_x and not rem:
        # Operands are (params, x2d): x2d is input index 1; output 0 has the
        # same shape/dtype, so the activation buffer can be updated in place.
        call_kwargs["input_output_aliases"] = {1: 0}

    out2d = pl.pallas_call(
        kernel,
        out_shape=jax.ShapeDtypeStruct((m, LANES), orig_dtype),
        grid_spec=pltpu.PrefetchScalarGridSpec(
            num_scalar_prefetch=0,
            grid=grid,
            in_specs=[
                pl.BlockSpec(memory_space=pltpu.MemorySpace.SMEM),  # params
                pl.BlockSpec((br, LANES), lambda i: (i, 0)),        # x tiles
            ],
            out_specs=pl.BlockSpec((br, LANES), lambda i: (i, 0)),
        ),
        compiler_params=pltpu.CompilerParams(
            dimension_semantics=tuple(dimension_semantics),
            vmem_limit_bytes=int(vmem_limit)),
        **call_kwargs,
    )(params, x2d)

    if rem:
        return out2d.reshape(-1)[:n].reshape(orig_shape)
    return out2d.reshape(orig_shape)


def q_hswish_ref(x, a_param, c_param, *, n_lv=0, act_func=True,
                 b=3.0 / 8.0, d=-3.0 / 8.0):
    """Pure-JAX reference mirroring the PyTorch forward."""
    x = x.astype(jnp.float32)
    if act_func:
        x = x * (jnp.clip(x + 3.0, 0.0, 6.0) / 6.0)
    if n_lv == 0:
        return x
    a = jax.nn.softplus(a_param.astype(jnp.float32))[0]
    c = jax.nn.softplus(c_param.astype(jnp.float32))[0]
    x = x + b
    x = jnp.clip(x / a, 0.0, 1.0)
    x = jnp.round(x * (n_lv - 1)) / (n_lv - 1) * c
    return x + d


if __name__ == "__main__":
    key = jax.random.PRNGKey(0)

    # Deterministic parameter init, mirroring Q_HSwish.initialize(n_lv, offset, diff)
    n_lv, offset, diff = 4, 2.0, 1.0
    init_val = np.log(np.exp(offset + diff) - 1.0).astype(np.float32)
    a_param = jnp.full((1,), init_val, dtype=jnp.float32)
    c_param = jnp.full((1,), init_val, dtype=jnp.float32)

    # --- Test 1: quantized path (n_lv != 0) with hard-swish, aligned shape ---
    x = jax.random.normal(key, (2, 4, 16, 16), dtype=jnp.float32) * 3.0
    out = jax.block_until_ready(q_hswish(x, a_param, c_param,
                                         n_lv=n_lv, act_func=True))
    ref = q_hswish_ref(x, a_param, c_param, n_lv=n_lv, act_func=True)
    np.testing.assert_allclose(np.asarray(out), np.asarray(ref),
                               rtol=1e-5, atol=1e-5)

    # --- Test 2: pass-through quant (n_lv == 0): just hard-swish ---
    out0 = jax.block_until_ready(q_hswish(x, a_param, c_param,
                                          n_lv=0, act_func=True))
    ref0 = q_hswish_ref(x, a_param, c_param, n_lv=0, act_func=True)
    np.testing.assert_allclose(np.asarray(out0), np.asarray(ref0),
                               rtol=1e-5, atol=1e-5)

    # --- Test 3: non-128-aligned numel + multi-step grid (block_rows=8) ---
    x_odd = jax.random.normal(jax.random.PRNGKey(1), (2, 3, 17, 19),
                              dtype=jnp.float32) * 3.0
    out_odd = jax.block_until_ready(q_hswish(x_odd, a_param, c_param,
                                             n_lv=n_lv, act_func=True,
                                             block_rows=8))
    ref_odd = q_hswish_ref(x_odd, a_param, c_param, n_lv=n_lv, act_func=True)
    np.testing.assert_allclose(np.asarray(out_odd), np.asarray(ref_odd),
                               rtol=1e-5, atol=1e-5)

    # --- Test 4: quantized path without activation (act_func=False) ---
    out_na = jax.block_until_ready(q_hswish(x, a_param, c_param,
                                            n_lv=n_lv, act_func=False))
    ref_na = q_hswish_ref(x, a_param, c_param, n_lv=n_lv, act_func=False)
    np.testing.assert_allclose(np.asarray(out_na), np.asarray(ref_na),
                               rtol=1e-5, atol=1e-5)

    # --- Test 5: identity short-circuit (n_lv=0, act_func=False) ---
    out_id = jax.block_until_ready(q_hswish(x, a_param, c_param,
                                            n_lv=0, act_func=False))
    np.testing.assert_array_equal(np.asarray(out_id), np.asarray(x))

    # --- Test 6: bf16 activations (f32 compute inside, bf16 store) ---
    x_bf16 = x.astype(jnp.bfloat16)
    out_bf = jax.block_until_ready(q_hswish(x_bf16, a_param, c_param,
                                            n_lv=n_lv, act_func=True))
    ref_bf = q_hswish_ref(x_bf16, a_param, c_param, n_lv=n_lv, act_func=True)
    np.testing.assert_allclose(np.asarray(out_bf).astype(np.float32),
                               np.asarray(ref_bf), rtol=2e-2, atol=2e-2)

    print("KERNEL_OK")
</pallas_src>

<mosaic_0001>
module attributes {stable_mosaic.version = 11 : i64} {
  func.func @_q_hswish_kernel(%arg0: i32, %arg1: memref<3xf32, #tpu.memory_space<smem>>, %arg2: memref<16x128xf32, #tpu.memory_space<vmem>>, %arg3: memref<16x128xf32, #tpu.memory_space<vmem>>) attributes {dimension_semantics = [#tpu.dimension_semantics<parallel>], iteration_bounds = array<i64: 1>, scalar_prefetch = 0 : i64, scratch_operands = 0 : i64, tpu.core_type = #tpu.core_type<tc>, window_params = [{transform_indices = @transform_0, window_bounds = array<i64: 3>}, {transform_indices = @transform_1, window_bounds = array<i64: 16, 128>}, {transform_indices = @transform_2, window_bounds = array<i64: 16, 128>}]} {
    %c0 = arith.constant 0 : index
    %c0_0 = arith.constant 0 : index
    %0 = vector.load %arg2[%c0, %c0_0] : memref<16x128xf32, #tpu.memory_space<vmem>>, vector<16x128xf32>
    %c0_1 = arith.constant 0 : index
    %1 = memref.load %arg1[%c0_1] : memref<3xf32, #tpu.memory_space<smem>>
    %c1 = arith.constant 1 : index
    %2 = memref.load %arg1[%c1] : memref<3xf32, #tpu.memory_space<smem>>
    %c2 = arith.constant 2 : index
    %3 = memref.load %arg1[%c2] : memref<3xf32, #tpu.memory_space<smem>>
    %cst = arith.constant 3.000000e+00 : f32
    %4 = vector.broadcast %cst : f32 to vector<16x128xf32>
    %5 = arith.addf %0, %4 : vector<16x128xf32>
    %cst_2 = arith.constant 0.000000e+00 : f32
    %cst_3 = arith.constant 6.000000e+00 : f32
    %6 = vector.broadcast %cst_2 : f32 to vector<16x128xf32>
    %7 = arith.maximumf %6, %5 : vector<16x128xf32>
    %8 = vector.broadcast %cst_3 : f32 to vector<16x128xf32>
    %9 = arith.minimumf %8, %7 : vector<16x128xf32>
    %10 = arith.mulf %0, %9 : vector<16x128xf32>
    %11 = vector.broadcast %1 : f32 to vector<16x128xf32>
    %12 = arith.mulf %10, %11 : vector<16x128xf32>
    %13 = vector.broadcast %2 : f32 to vector<16x128xf32>
    %14 = arith.addf %12, %13 : vector<16x128xf32>
    %cst_4 = arith.constant 0.000000e+00 : f32
    %cst_5 = arith.constant 3.000000e+00 : f32
    %15 = vector.broadcast %cst_4 : f32 to vector<16x128xf32>
    %16 = arith.maximumf %15, %14 : vector<16x128xf32>
    %17 = vector.broadcast %cst_5 : f32 to vector<16x128xf32>
    %18 = arith.minimumf %17, %16 : vector<16x128xf32>
    %19 = math.roundeven %18 : vector<16x128xf32>
    %20 = vector.broadcast %3 : f32 to vector<16x128xf32>
    %21 = arith.mulf %19, %20 : vector<16x128xf32>
    %cst_6 = arith.constant -3.750000e-01 : f32
    %22 = vector.broadcast %cst_6 : f32 to vector<16x128xf32>
    %23 = arith.addf %21, %22 : vector<16x128xf32>
    %c0_7 = arith.constant 0 : index
    %c0_8 = arith.constant 0 : index
    %24 = vector.load %arg3[%c0_7, %c0_8] : memref<16x128xf32, #tpu.memory_space<vmem>>, vector<16x128xf32>
    tpu.vector_store %arg3[%c0_7, %c0_8], %23 {strides = array<i32>} : memref<16x128xf32, #tpu.memory_space<vmem>>, vector<16x128xf32>,
    return
  }
  func.func @transform_0(%arg0: i32) -> i32 {
    %c0_i32 = arith.constant 0 : i32
    %c0_i32_0 = arith.constant 0 : i32
    return %c0_i32 : i32
  }
  func.func @transform_1(%arg0: i32) -> (i32, i32) {
    %c0_i32 = arith.constant 0 : i32
    %c0_i32_0 = arith.constant 0 : i32
    return %arg0, %c0_i32 : i32, i32
  }
  func.func @transform_2(%arg0: i32) -> (i32, i32) {
    %c0_i32 = arith.constant 0 : i32
    %c0_i32_0 = arith.constant 0 : i32
    return %arg0, %c0_i32 : i32, i32
  }
}

</mosaic_0001>

<bundles_post_ra>
// kernel: tpu_custom_call.1
= control target key start
LH: loop header
LB: loop body
LE: loop exit
PB: predicated region body
PF: predicated region fallthrough
CT: control target
= control target key end

     0   :  { %7 = vsyncpa [#allocation5], 0  ;;  %s199_s0 = inlined_call_operand.hbm [shape: f32[3], index: 0, kind: input, shape index: {}]   ;;  %s200_s1 = inlined_call_operand.hbm [shape: f32[16,128], index: 1, kind: input, shape index: {}]   ;;  %s201_s2 = inlined_call_operand.hbm [shape: f32[16,128], index: 2, kind: output, shape index: {}]  }
   0x1   :  { %8 = vsyncpa [#allocation3], 0 }
   0x2   :  { %9 = vsyncpa [#allocation4], 0  ;;  %s164_s9 = smov [#allocation2]   ;;  %s165_s12 = smov [#allocation6]  }
   0x3   :  { %17 = dma.hbm_to_smem %s199_s0, 16, %s164_s9, [#allocation5]  }
   0x4   :  { %s23_s13 = sshll.u32 %s165_s12, 4  ;;  %s24_s13 = int_to_ptr.vmem [resolvable:$true] %s23_s13 }
   0x5   :  { %s126_s14 = scalar_lea.vmem %s24_s13, 256  ;;  %p131_p1 = scmp.lt.s32.totalorder %s24_s13, %s24_s13 }
   0x6   :  { %p127_p0 = scmp.ne.s32.totalorder %s24_s13, %s126_s14  ;;  %p132_p2 = scmp.lt.s32.totalorder %s126_s14, %s126_s14 }
   0x8   :  { %p133_p3 = por %p132_p2, %p131_p1 }
   0xa   :  { %p134_p4 = pnand %p133_p3, %p127_p0 }
   0xc   :  { %137 = shalt.err (!%p134_p4)
}
   0xd   :  { %s166_s15 = smov 128   ;;  %s167_s16 = smov 8  }
   0xe   :  { %29 = dma.hbm_to_vmem [thread:$0]  %s200_s1, 256, %s24_s13, [#allocation3], %s166_s15, %s166_s15, %s167_s16  }
   0xf   :  { %158 = dma.done.wait [#allocation5], 16  }
  0x10   :  { %159 = vsyncadd [#allocation5], 4294967280 }
  0x11   :  { %160 = dma.done.wait [#allocation3], 256  }
  0x12   :  { %161 = vsyncadd [#allocation3], 4294967040 }
  0x13   :  { %36 = sfence }
  0x14   :  { %v37_v0 = vld [vmem:[#allocation6] sm:$0xff]  ;;  %s39_s0 = sld [smem:[#allocation2]]  ;;  %v38_v1 = vld [vmem:[#allocation6 + $0x8] sm:$0xff]  ;;  %s168_s20 = smov [#allocation7]  }
  0x15   :  { %s87_s19 = sld [smem:[#allocation2 + $0x1]]  ;;  %v42_v2 = vadd.f32 3.0, %v37_v0  ;;  %v43_v3 = vadd.f32 3.0, %v38_v1  ;;  %s74_s21 = sshll.u32 %s168_s20, 4  ;;  %s75_s21 = int_to_ptr.vmem [resolvable:$true] %s74_s21 }
  0x16   :  { %s88_s1 = sld [smem:[#allocation2 + $0x2]]  ;;  %s138_s22 = scalar_lea.vmem %s75_s21, 256 }
  0x17   :  { %v44_v4 = vmax.f32 %v42_v2, 0.0  ;;  %v45_v5 = vmax.f32 %v43_v3, 0.0  ;;  %p139_p5 = scmp.ne.s32.totalorder %s75_s21, %s138_s22  ;;  %p143_p6 = scmp.lt.s32.totalorder %s75_s21, %s75_s21 }
  0x18   :  { %p144_p7 = scmp.lt.s32.totalorder %s138_s22, %s138_s22 }
  0x19   :  { %v46_v6 = vmin.f32 %v44_v4, 6.0  ;;  %v47_v7 = vmin.f32 %v45_v5, 6.0 }
  0x1a   :  { %v50_v8 = vstv %s39_s0  ;;  %p145_p8 = por %p144_p7, %p143_p6 }
  0x1b   :  { %v48_v9 = vmul.f32 %v46_v6, %v37_v0  ;;  %v49_v10 = vmul.f32 %v47_v7, %v38_v1  ;;  %v53_v11 = vstv %s87_s19 }
  0x1c   :  { %v62_v31 = vstv %s88_s1  ;;  %p146_p9 = pnand %p145_p8, %p139_p5 }
  0x1d   :  { %v51_v12 = vmul.f32 %v50_v8, %v48_v9  ;;  %v52_v13 = vmul.f32 %v50_v8, %v49_v10 }
  0x1f   :  { %v54_v14 = vadd.f32 %v53_v11, %v51_v12  ;;  %v55_v15 = vadd.f32 %v53_v11, %v52_v13 }
  0x21   :  { %v56_v16 = vmax.f32 %v54_v14, 0.0  ;;  %v57_v17 = vmax.f32 %v55_v15, 0.0 }
  0x23   :  { %v58_v18 = vmin.f32 %v56_v16, 3.0  ;;  %v59_v19 = vmin.f32 %v57_v17, 3.0 }
  0x25   :  { %v91_v20 = vcvt.f32.s32 %v58_v18  ;;  %v89_v21 = vand.u32 2147483647, %v58_v18  ;;  %v99_v22 = vcvt.f32.s32 %v59_v19  ;;  %v94_v24 = vand.u32 2147483648, %v58_v18 }
  0x26   :  { %v97_v25 = vand.u32 2147483647, %v59_v19  ;;  %v102_v27 = vand.u32 2147483648, %v59_v19 }
  0x27   :  { %v92_v23 = vcvt.s32.f32 %v91_v20  ;;  %v100_v26 = vcvt.s32.f32 %v99_v22  ;;  %vm90_vm0 = vcmp.lt.f32.partialorder %v89_v21, 8388608.0 }
  0x28   :  { %vm98_vm1 = vcmp.lt.f32.partialorder %v97_v25, 8388608.0 }
  0x29   :  { %v93_v28 = vand.u32 2147483647, %v92_v23  ;;  %v101_v29 = vand.u32 2147483647, %v100_v26 }
  0x2b   :  { %v95_v30 = vor.u32 %v94_v24, %v93_v28  ;;  %v103_v32 = vor.u32 %v102_v27, %v101_v29 }
  0x2d   :  { %v96_v33 = vsel %vm90_vm0, %v95_v30, %v58_v18  ;;  %v104_v35 = vsel %vm98_vm1, %v103_v32, %v59_v19 }
  0x2e   :  { %v63_v34 = vmul.f32 %v96_v33, %v62_v31  ;;  %v64_v36 = vmul.f32 %v104_v35, %v62_v31 }
  0x30   :  { %v65_v37 = vadd.f32 -0.375, %v63_v34  ;;  %v66_v38 = vadd.f32 -0.375, %v64_v36 }
  0x32   :  { %67 = vst [vmem:[#allocation7] sm:$0xff] %v65_v37  ;;  %68 = vst [vmem:[#allocation7 + $0x8] sm:$0xff] %v66_v38 }
  0x33   :  { %149 = shalt.err (!%p146_p9)
}
  0x34   :  { %80 = dma.vmem_to_hbm [thread:$0]  %s75_s21, 256, %s201_s2, [#allocation4], %s166_s15, %s166_s15, %s167_s16  }
  0x35   :  { %162 = dma.done.wait [#allocation4], 256  }
  0x36   :  { %163 = vsyncadd [#allocation4], 4294967040 }
  0x37   :  { %84 = vsyncpa [#allocation3], 1 }
  0x38   :  { %85 = vsyncpa [#allocation4], 1 }
  0x39   :  { %86 = vsyncpa [#allocation5], 1 }

</bundles_post_ra>
